<compile_context>
chip_gen: v6e
topology: v6e:2x2x1
jax: 0.10.0
libtpu: 0.0.40
codegen_flags: <defaults>
</compile_context>

<pallas_src>
import jax
import jax.numpy as jnp
from jax.experimental import pallas as pl
from jax.experimental.pallas import tpu as pltpu

LANE = 128
HIDDEN = 256


def _round_up(x, m):
    return ((x + m - 1) // m) * m


def dqn_kernel(x_ref, w1_ref, b1_ref, w2_ref, b2_ref, w3_ref, b3_ref, o_ref):
    # bf16 operands -> native MXU throughput; f32 accumulation + f32 elementwise.
    x = x_ref[...]
    h1 = jnp.dot(x, w1_ref[...], preferred_element_type=jnp.float32) + b1_ref[...]
    h1 = jnp.maximum(h1, 0.0).astype(jnp.bfloat16)
    h2 = jnp.dot(h1, w2_ref[...], preferred_element_type=jnp.float32) + b2_ref[...]
    h2 = jnp.maximum(h2, 0.0).astype(jnp.bfloat16)
    q = jnp.dot(h2, w3_ref[...], preferred_element_type=jnp.float32) + b3_ref[...]
    o_ref[...] = q  # lane-dense (tile_b, out_pad) f32 store


def init_dqn_params(key, input_dim, output_dim, hidden=HIDDEN):
    """PyTorch-style (uniform +/- 1/sqrt(fan_in)) init, raw f32 layout."""
    ks = jax.random.split(key, 6)

    def linear_init(kw, kb, fan_in, fan_out):
        bound = 1.0 / jnp.sqrt(fan_in)
        w = jax.random.uniform(kw, (fan_in, fan_out), jnp.float32, -bound, bound)
        b = jax.random.uniform(kb, (1, fan_out), jnp.float32, -bound, bound)
        return w, b

    w1, b1 = linear_init(ks[0], ks[1], input_dim, hidden)
    w2, b2 = linear_init(ks[2], ks[3], hidden, hidden)
    w3, b3 = linear_init(ks[4], ks[5], hidden, output_dim)
    return {"w1": w1, "b1": b1, "w2": w2, "b2": b2, "w3": w3, "b3": b3}


def prepare_dqn_params(raw):
    """One-time pad + cast into the kernel layout.

    - w1 rows padded to a multiple of 128 (zeros -> no effect on result).
    - w3 cols and b3 padded to a multiple of 128 (zeros in padded Q columns).
    - weights cast to bf16; biases kept f32.
    """
    w1, b1 = raw["w1"], raw["b1"]
    w2, b2 = raw["w2"], raw["b2"]
    w3, b3 = raw["w3"], raw["b3"]
    in_dim, hidden = w1.shape
    out_dim = w3.shape[1]
    in_pad = _round_up(in_dim, LANE)
    out_pad = _round_up(out_dim, LANE)

    w1p = jnp.zeros((in_pad, hidden), jnp.float32).at[:in_dim, :].set(w1)
    w3p = jnp.zeros((hidden, out_pad), jnp.float32).at[:, :out_dim].set(w3)
    b3p = jnp.zeros((1, out_pad), jnp.float32).at[:, :out_dim].set(b3)

    return {
        "w1": w1p.astype(jnp.bfloat16),
        "b1": b1.astype(jnp.float32),
        "w2": w2.astype(jnp.bfloat16),
        "b2": b2.astype(jnp.float32),
        "w3": w3p.astype(jnp.bfloat16),
        "b3": b3p.astype(jnp.float32),
    }


def dqn_forward(x, p, out_dim, *, tile_b=None):
    """x: (B, input_dim) f32; p: prepared (padded/bf16) params; returns (B, out_dim) f32."""
    B, in_dim = x.shape
    in_pad, hidden = p["w1"].shape
    out_pad = p["w3"].shape[1]
    assert in_dim <= in_pad and out_dim <= out_pad

    if tile_b is None:
        if B >= 512:
            tile_b = 256        # multiple of MXU M (128 v5e / 256 v6e,v7x), many grid steps
        elif B >= 128:
            tile_b = 128
        else:
            tile_b = _round_up(B, 16)  # bf16 sublane-pack aligned small tile
    B_pad = _round_up(B, tile_b)

    # Lane-dense, zero-padded x; padded rows/cols multiply zero w1 rows -> exact.
    xp = jnp.zeros((B_pad, in_pad), jnp.float32).at[:B, :in_dim].set(x)
    xp = xp.astype(jnp.bfloat16)

    grid = (B_pad // tile_b,)

    def rep(shape):
        # weights/biases resident in VMEM across all batch tiles
        return pl.BlockSpec(shape, lambda i: (0, 0))

    out = pl.pallas_call(
        dqn_kernel,
        out_shape=jax.ShapeDtypeStruct((B_pad, out_pad), jnp.float32),
        grid_spec=pltpu.PrefetchScalarGridSpec(
            num_scalar_prefetch=0,
            grid=grid,
            in_specs=[
                pl.BlockSpec((tile_b, in_pad), lambda i: (i, 0)),   # x tile (bf16)
                rep((in_pad, hidden)),                              # w1 (bf16)
                rep((1, hidden)),                                   # b1 (f32)
                rep((hidden, hidden)),                              # w2 (bf16)
                rep((1, hidden)),                                   # b2 (f32)
                rep((hidden, out_pad)),                             # w3 (bf16)
                rep((1, out_pad)),                                  # b3 (f32)
            ],
            out_specs=pl.BlockSpec((tile_b, out_pad), lambda i: (i, 0)),
        ),
        compiler_params=pltpu.CompilerParams(
            dimension_semantics=("parallel",),
        ),
    )(xp, p["w1"], p["b1"], p["w2"], p["b2"], p["w3"], p["b3"])

    return out[:B, :out_dim]


def dqn_ref(x, raw):
    h1 = jnp.maximum(x @ raw["w1"] + raw["b1"], 0.0)
    h2 = jnp.maximum(h1 @ raw["w2"] + raw["b2"], 0.0)
    return h2 @ raw["w3"] + raw["b3"]


if __name__ == "__main__":
    key = jax.random.PRNGKey(0)
    k_param, k_x = jax.random.split(key)

    batch = 8
    input_dim = 16   # small state vector
    output_dim = 4   # number of discrete actions

    raw_params = init_dqn_params(k_param, input_dim, output_dim)
    params = prepare_dqn_params(raw_params)
    x = jax.random.normal(k_x, (batch, input_dim), jnp.float32)

    q = dqn_forward(x, params, output_dim)
    q = jax.block_until_ready(q)

    q_ref = dqn_ref(x, raw_params)
    assert q.shape == (batch, output_dim)
    # bf16 matmul inputs (f32 accumulation) -> loosened tolerance vs f32 reference
    assert jnp.allclose(q, q_ref, atol=3e-2, rtol=3e-2), float(
        jnp.max(jnp.abs(q - q_ref))
    )

    print("KERNEL_OK")
</pallas_src>

<mosaic_0001>
module attributes {stable_mosaic.version = 11 : i64} {
  func.func @dqn_kernel(%arg0: i32, %arg1: memref<16x128xbf16, #tpu.memory_space<vmem>>, %arg2: memref<128x256xbf16, #tpu.memory_space<vmem>>, %arg3: memref<1x256xf32, #tpu.memory_space<vmem>>, %arg4: memref<256x256xbf16, #tpu.memory_space<vmem>>, %arg5: memref<1x256xf32, #tpu.memory_space<vmem>>, %arg6: memref<256x128xbf16, #tpu.memory_space<vmem>>, %arg7: memref<1x128xf32, #tpu.memory_space<vmem>>, %arg8: memref<16x128xf32, #tpu.memory_space<vmem>>) attributes {dimension_semantics = [#tpu.dimension_semantics<parallel>], iteration_bounds = array<i64: 1>, scalar_prefetch = 0 : i64, scratch_operands = 0 : i64, tpu.core_type = #tpu.core_type<tc>, window_params = [{transform_indices = @transform_0, window_bounds = array<i64: 16, 128>}, {pipeline_mode = #tpu.pipeline_mode<synchronous>, transform_indices = @transform_1, window_bounds = array<i64: 128, 256>}, {pipeline_mode = #tpu.pipeline_mode<synchronous>, transform_indices = @transform_2, window_bounds = array<i64: 1, 256>}, {pipeline_mode = #tpu.pipeline_mode<synchronous>, transform_indices = @transform_3, window_bounds = array<i64: 256, 256>}, {pipeline_mode = #tpu.pipeline_mode<synchronous>, transform_indices = @transform_4, window_bounds = array<i64: 1, 256>}, {pipeline_mode = #tpu.pipeline_mode<synchronous>, transform_indices = @transform_5, window_bounds = array<i64: 256, 128>}, {pipeline_mode = #tpu.pipeline_mode<synchronous>, transform_indices = @transform_6, window_bounds = array<i64: 1, 128>}, {transform_indices = @transform_7, window_bounds = array<i64: 16, 128>}]} {
    %c0 = arith.constant 0 : index
    %c0_0 = arith.constant 0 : index
    %0 = vector.load %arg1[%c0, %c0_0] : memref<16x128xbf16, #tpu.memory_space<vmem>>, vector<16x128xbf16>
    %c0_1 = arith.constant 0 : index
    %c0_2 = arith.constant 0 : index
    %1 = vector.load %arg2[%c0_1, %c0_2] : memref<128x256xbf16, #tpu.memory_space<vmem>>, vector<128x256xbf16>
    %cst = arith.constant dense<0.000000e+00> : vector<16x256xf32>
    %2 = tpu.matmul %0, %1, %cst {dimension_numbers = #tpu.dot_dimension_numbers<[1], [0], [0], [1], [0, 0, 1, 1], [], []>} : vector<16x128xbf16>, vector<128x256xbf16>, vector<16x256xf32> -> vector<16x256xf32>
    %c0_3 = arith.constant 0 : index
    %c0_4 = arith.constant 0 : index
    %3 = vector.load %arg3[%c0_3, %c0_4] : memref<1x256xf32, #tpu.memory_space<vmem>>, vector<1x256xf32>
    %4 = vector.broadcast %3 : vector<1x256xf32> to vector<16x256xf32>
    %5 = arith.addf %2, %4 : vector<16x256xf32>
    %cst_5 = arith.constant 0.000000e+00 : f32
    %6 = vector.broadcast %cst_5 : f32 to vector<16x256xf32>
    %7 = arith.maximumf %5, %6 : vector<16x256xf32>
    %8 = arith.truncf %7 : vector<16x256xf32> to vector<16x256xbf16>
    %c0_6 = arith.constant 0 : index
    %c0_7 = arith.constant 0 : index
    %9 = vector.load %arg4[%c0_6, %c0_7] : memref<256x256xbf16, #tpu.memory_space<vmem>>, vector<256x256xbf16>
    %cst_8 = arith.constant dense<0.000000e+00> : vector<16x256xf32>
    %10 = tpu.matmul %8, %9, %cst_8 {dimension_numbers = #tpu.dot_dimension_numbers<[1], [0], [0], [1], [0, 0, 1, 1], [], []>} : vector<16x256xbf16>, vector<256x256xbf16>, vector<16x256xf32> -> vector<16x256xf32>
    %c0_9 = arith.constant 0 : index
    %c0_10 = arith.constant 0 : index
    %11 = vector.load %arg5[%c0_9, %c0_10] : memref<1x256xf32, #tpu.memory_space<vmem>>, vector<1x256xf32>
    %12 = vector.broadcast %11 : vector<1x256xf32> to vector<16x256xf32>
    %13 = arith.addf %10, %12 : vector<16x256xf32>
    %cst_11 = arith.constant 0.000000e+00 : f32
    %14 = vector.broadcast %cst_11 : f32 to vector<16x256xf32>
    %15 = arith.maximumf %13, %14 : vector<16x256xf32>
    %16 = arith.truncf %15 : vector<16x256xf32> to vector<16x256xbf16>
    %c0_12 = arith.constant 0 : index
    %c0_13 = arith.constant 0 : index
    %17 = vector.load %arg6[%c0_12, %c0_13] : memref<256x128xbf16, #tpu.memory_space<vmem>>, vector<256x128xbf16>
    %cst_14 = arith.constant dense<0.000000e+00> : vector<16x128xf32>
    %18 = tpu.matmul %16, %17, %cst_14 {dimension_numbers = #tpu.dot_dimension_numbers<[1], [0], [0], [1], [0, 0, 1, 1], [], []>} : vector<16x256xbf16>, vector<256x128xbf16>, vector<16x128xf32> -> vector<16x128xf32>
    %c0_15 = arith.constant 0 : index
    %c0_16 = arith.constant 0 : index
    %19 = vector.load %arg7[%c0_15, %c0_16] : memref<1x128xf32, #tpu.memory_space<vmem>>, vector<1x128xf32>
    %20 = vector.broadcast %19 : vector<1x128xf32> to vector<16x128xf32>
    %21 = arith.addf %18, %20 : vector<16x128xf32>
    %c0_17 = arith.constant 0 : index
    %c0_18 = arith.constant 0 : index
    %22 = vector.load %arg8[%c0_17, %c0_18] : memref<16x128xf32, #tpu.memory_space<vmem>>, vector<16x128xf32>
    tpu.vector_store %arg8[%c0_17, %c0_18], %21 {strides = array<i32>} : memref<16x128xf32, #tpu.memory_space<vmem>>, vector<16x128xf32>,
    return
  }
  func.func @transform_0(%arg0: i32) -> (i32, i32) {
    %c0_i32 = arith.constant 0 : i32
    %c0_i32_0 = arith.constant 0 : i32
    return %arg0, %c0_i32 : i32, i32
  }
  func.func @transform_1(%arg0: i32) -> (i32, i32) {
    %c0_i32 = arith.constant 0 : i32
    %c0_i32_0 = arith.constant 0 : i32
    %c0_i32_1 = arith.constant 0 : i32
    return %c0_i32, %c0_i32_0 : i32, i32
  }
  func.func @transform_2(%arg0: i32) -> (i32, i32) {
    %c0_i32 = arith.constant 0 : i32
    %c0_i32_0 = arith.constant 0 : i32
    %c0_i32_1 = arith.constant 0 : i32
    return %c0_i32, %c0_i32_0 : i32, i32
  }
  func.func @transform_3(%arg0: i32) -> (i32, i32) {
    %c0_i32 = arith.constant 0 : i32
    %c0_i32_0 = arith.constant 0 : i32
    %c0_i32_1 = arith.constant 0 : i32
    return %c0_i32, %c0_i32_0 : i32, i32
  }
  func.func @transform_4(%arg0: i32) -> (i32, i32) {
    %c0_i32 = arith.constant 0 : i32
    %c0_i32_0 = arith.constant 0 : i32
    %c0_i32_1 = arith.constant 0 : i32
    return %c0_i32, %c0_i32_0 : i32, i32
  }
  func.func @transform_5(%arg0: i32) -> (i32, i32) {
    %c0_i32 = arith.constant 0 : i32
    %c0_i32_0 = arith.constant 0 : i32
    %c0_i32_1 = arith.constant 0 : i32
    return %c0_i32, %c0_i32_0 : i32, i32
  }
  func.func @transform_6(%arg0: i32) -> (i32, i32) {
    %c0_i32 = arith.constant 0 : i32
    %c0_i32_0 = arith.constant 0 : i32
    %c0_i32_1 = arith.constant 0 : i32
    return %c0_i32, %c0_i32_0 : i32, i32
  }
  func.func @transform_7(%arg0: i32) -> (i32, i32) {
    %c0_i32 = arith.constant 0 : i32
    %c0_i32_0 = arith.constant 0 : i32
    return %arg0, %c0_i32 : i32, i32
  }
}

</mosaic_0001>

<bundles_post_ra>
// kernel: tpu_custom_call.1
= control target key start
LH: loop header
LB: loop body
LE: loop exit
PB: predicated region body
PF: predicated region fallthrough
CT: control target
= control target key end

     0   :  { %12 = vsyncpa [#allocation3], 0  ;;  %s1076_s0 = inlined_call_operand.hbm [shape: bf16[16,128], index: 0, kind: input, shape index: {}]   ;;  %s1077_s1 = inlined_call_operand.hbm [shape: bf16[128,256], index: 1, kind: input, shape index: {}]   ;;  %s1078_s2 = inlined_call_operand.vmem [shape: f32[1,256], index: 2, kind: input, shape index: {}]   ;;  %s1079_s3 = inlined_call_operand.hbm [shape: bf16[256,256], index: 3, kind: input, shape index: {}]   ;;  %s1080_s4 = inlined_call_operand.vmem [shape: f32[1,256], index: 4, kind: input, shape index: {}]   ;;  %s1081_s5 = inlined_call_operand.hbm [shape: bf16[256,128], index: 5, kind: input, shape index: {}]   ;;  %s1082_s6 = inlined_call_operand.vmem [shape: f32[1,128], index: 6, kind: input, shape index: {}]   ;;  %s1083_s7 = inlined_call_operand.hbm [shape: f32[16,128], index: 7, kind: output, shape index: {}]  }
   0x1   :  { %13 = vsyncpa [#allocation6], 0 }
   0x2   :  { %14 = vsyncpa [#allocation9], 0 }
   0x3   :  { %15 = vsyncpa [#allocation4], 0  ;;  %s993_s24 = smov [#allocation5]  }
   0x4   :  { %s33_s25 = sshll.u32 %s993_s24, 4  ;;  %s34_s25 = int_to_ptr.vmem [resolvable:$true] %s33_s25 }
   0x5   :  { %s893_s26 = scalar_lea.vmem %s34_s25, 2048  ;;  %p898_p1 = scmp.lt.s32.totalorder %s34_s25, %s34_s25 }
   0x6   :  { %p894_p0 = scmp.ne.s32.totalorder %s34_s25, %s893_s26  ;;  %p899_p2 = scmp.lt.s32.totalorder %s893_s26, %s893_s26 }
   0x8   :  { %p900_p3 = por %p899_p2, %p898_p1 }
   0xa   :  { %p901_p4 = pnand %p900_p3, %p894_p0 }
   0xc   :  { %904 = shalt.err (!%p901_p4)
}
   0xd   :  { %s994_s27 = smov 128   ;;  %s995_s28 = smov 8  }
   0xe   :  { %39 = dma.hbm_to_vmem [thread:$0]  %s1077_s1, 2048, %s34_s25, [#allocation6], %s994_s27, %s994_s27, %s995_s28  }
   0xf   :  { %s996_s8 = smov [#allocation2]  }
  0x10   :  { %s21_s9 = sshll.u32 %s996_s8, 4  ;;  %s22_s9 = int_to_ptr.vmem [resolvable:$true] %s21_s9 }
  0x11   :  { %s913_s10 = scalar_lea.vmem %s22_s9, 128  ;;  %p918_p6 = scmp.lt.s32.totalorder %s22_s9, %s22_s9 }
  0x12   :  { %p914_p5 = scmp.ne.s32.totalorder %s22_s9, %s913_s10  ;;  %p919_p7 = scmp.lt.s32.totalorder %s913_s10, %s913_s10 }
  0x14   :  { %p920_p8 = por %p919_p7, %p918_p6 }
  0x16   :  { %p921_p9 = pnand %p920_p8, %p914_p5 }
  0x18   :  { %924 = shalt.err (!%p921_p9)
}
  0x19   :  { %s997_s11 = smov 64   ;;  %s998_s12 = smov 4  }
  0x1a   :  { %27 = dma.hbm_to_vmem [thread:$0]  %s1076_s0, 128, %s22_s9, [#allocation3], %s997_s11, %s997_s11, %s998_s12  }
  0x1b   :  { %s999_s15 = smov [#allocation7]   ;;  %s1000_s17 = smov [#allocation8]  }
  0x1c   :  { %s47_s16 = sshll.u32 %s999_s15, 4  ;;  %s61_s1 = sshll.u32 %s1000_s17, 4  ;;  %s48_s16 = int_to_ptr.vmem [resolvable:$true] %s47_s16  ;;  %s62_s1 = int_to_ptr.vmem [resolvable:$true] %s61_s1 }
  0x1d   :  { %s933_s18 = scalar_lea.vmem %s48_s16, 4096  ;;  %p938_p11 = scmp.lt.s32.totalorder %s48_s16, %s48_s16 }
  0x1e   :  { %p934_p10 = scmp.ne.s32.totalorder %s48_s16, %s933_s18  ;;  %p939_p12 = scmp.lt.s32.totalorder %s933_s18, %s933_s18 }
  0x20   :  { %p940_p13 = por %p939_p12, %p938_p11 }
  0x22   :  { %p941_p0 = pnand %p940_p13, %p934_p10 }
  0x24   :  { %944 = shalt.err (!%p941_p0)
}
  0x25   :  { %53 = dma.hbm_to_vmem [thread:$0]  %s1079_s3, 4096, %s48_s16, [#allocation6], %s994_s27, %s994_s27, %s995_s28  }
  0x26   :  { %s953_s0 = scalar_lea.vmem %s62_s1, 2048  ;;  %p958_p2 = scmp.lt.s32.totalorder %s62_s1, %s62_s1 }
  0x27   :  { %p954_p1 = scmp.ne.s32.totalorder %s62_s1, %s953_s0  ;;  %p959_p3 = scmp.lt.s32.totalorder %s953_s0, %s953_s0 }
  0x29   :  { %p960_p4 = por %p959_p3, %p958_p2 }
  0x2b   :  { %p961_p5 = pnand %p960_p4, %p954_p1 }
  0x2d   :  { %964 = shalt.err (!%p961_p5)
}
  0x2e   :  { %67 = dma.hbm_to_vmem [thread:$0]  %s1081_s5, 2048, %s62_s1, [#allocation9], %s997_s11, %s997_s11, %s998_s12  }
  0x2f   :  { %985 = dma.done.wait [#allocation3], 128  }
  0x30   :  { %986 = vsyncadd [#allocation3], 4294967168 }
  0x31   :  { %987 = dma.done.wait [#allocation6], 6144  }
  0x32   :  { %988 = vsyncadd [#allocation6], 4294961152 }
  0x33   :  { %989 = dma.done.wait [#allocation9], 2048  }
  0x34   :  { %990 = vsyncadd [#allocation9], 4294965248  ;;  %v1001_v0 = vmov 0   ;;  %v796_v1 = vld [vmem:[#allocation5 + $0x74] ss:$8 sps:$4 sm:$0xff]   ;;  %v873_v54 = vld [vmem:[#allocation8 + $0x68] sm:$0xff]   ;;  %v103_v60 = vlaneseq }
  0x35   :  { %231 = vmatprep.mubr.bf16.mxu0 %v1001_v0  ;;  %v798_v2 = vld [vmem:[#allocation5 + $0x70] ss:$8 sps:$4 sm:$0xff]   ;;  %199 = vmatprep.subr.bf16.mxu0 %v796_v1  ;;  %v799_v3 = vld [vmem:[#allocation5 + $0x64] ss:$8 sps:$4 sm:$0xff]   ;;  %v801_v4 = vld [vmem:[#allocation5 + $0x60] ss:$8 sps:$4 sm:$0xff]  }
  0x36   :  { %200 = vmatpush1.bf16.msra.mxu0 %v798_v2  ;;  %v802_v5 = vld [vmem:[#allocation5 + $0x54] ss:$8 sps:$4 sm:$0xff]   ;;  %v804_v6 = vld [vmem:[#allocation5 + $0x50] ss:$8 sps:$4 sm:$0xff]   ;;  %v805_v7 = vld [vmem:[#allocation5 + $0x44] ss:$8 sps:$4 sm:$0xff]  }
  0x37   :  { %201 = vmatprep.subr.bf16.mxu0 %v799_v3  ;;  %v807_v8 = vld [vmem:[#allocation5 + $0x40] ss:$8 sps:$4 sm:$0xff]   ;;  %v808_v9 = vld [vmem:[#allocation5 + $0x34] ss:$8 sps:$4 sm:$0xff]   ;;  %v823_v11 = vld [vmem:[#allocation7 + $0x70] ss:$8 sps:$4 sm:$0xff]  }
  0x38   :  { %v821_v10 = vld [vmem:[#allocation7 + $0x74] ss:$8 sps:$4 sm:$0xff]   ;;  %v824_v12 = vld [vmem:[#allocation7 + $0x64] ss:$8 sps:$4 sm:$0xff]   ;;  %v810_v13 = vld [vmem:[#allocation5 + $0x30] ss:$8 sps:$4 sm:$0xff]  }
  0x39   :  { %452 = vmatprep.subr.bf16.mxu1 %v821_v10  ;;  %v826_v14 = vld [vmem:[#allocation7 + $0x60] ss:$8 sps:$4 sm:$0xff]   ;;  %v811_v15 = vld [vmem:[#allocation5 + $0x24] ss:$8 sps:$4 sm:$0xff]   ;;  %v827_v16 = vld [vmem:[#allocation7 + $0x54] ss:$8 sps:$4 sm:$0xff]  }
  0x3a   :  { %202 = vmatpush1.bf16.msra.mxu0 %v801_v4  ;;  %453 = vmatpush1.bf16.msra.mxu1 %v823_v11  ;;  %v813_v17 = vld [vmem:[#allocation5 + $0x20] ss:$8 sps:$4 sm:$0xff]   ;;  %v829_v18 = vld [vmem:[#allocation7 + $0x50] ss:$8 sps:$4 sm:$0xff]   ;;  %v814_v19 = vld [vmem:[#allocation5 + $0x14] ss:$8 sps:$4 sm:$0xff]  }
  0x3b   :  { %203 = vmatprep.subr.bf16.mxu0 %v802_v5  ;;  %454 = vmatprep.subr.bf16.mxu1 %v824_v12  ;;  %v830_v20 = vld [vmem:[#allocation7 + $0x44] ss:$8 sps:$4 sm:$0xff]   ;;  %v816_v21 = vld [vmem:[#allocation5 + $0x10] ss:$8 sps:$4 sm:$0xff]   ;;  %v832_v22 = vld [vmem:[#allocation7 + $0x40] ss:$8 sps:$4 sm:$0xff]  }
  0x3c   :  { %v817_v23 = vld [vmem:[#allocation5 + $0x4] ss:$8 sps:$4 sm:$0xff]   ;;  %v833_v24 = vld [vmem:[#allocation7 + $0x34] ss:$8 sps:$4 sm:$0xff]   ;;  %v819_v25 = vld [vmem:[#allocation5] ss:$8 sps:$4 sm:$0xff]  }
  0x3d   :  { %v835_v26 = vld [vmem:[#allocation7 + $0x30] ss:$8 sps:$4 sm:$0xff]   ;;  %v836_v28 = vld [vmem:[#allocation7 + $0x24] ss:$8 sps:$4 sm:$0xff]   ;;  %v838_v29 = vld [vmem:[#allocation7 + $0x20] ss:$8 sps:$4 sm:$0xff]  }
  0x3e   :  { %204 = vmatpush1.bf16.msra.mxu0 %v804_v6  ;;  %455 = vmatpush1.bf16.msra.mxu1 %v826_v14  ;;  %v820_v27 = vld [vmem:[#allocation2] sm:$0xff]   ;;  %v842_v32 = vld [vmem:[#allocation7 + $0x4] ss:$8 sps:$4 sm:$0xff]   ;;  %v844_v33 = vld [vmem:[#allocation7] ss:$8 sps:$4 sm:$0xff]   ;;  %v104_v61 = vshrl.u32 %v103_v60, 7 }
  0x3f   :  { %205 = vmatprep.subr.bf16.mxu0 %v805_v7  ;;  %456 = vmatprep.subr.bf16.mxu1 %v827_v16  ;;  %v839_v30 = vld [vmem:[#allocation7 + $0x14] ss:$8 sps:$4 sm:$0xff]   ;;  %v841_v31 = vld [vmem:[#allocation7 + $0x10] ss:$8 sps:$4 sm:$0xff]   ;;  %v848_v36 = vld [vmem:[#allocation7 + $0xe4] ss:$8 sps:$4 sm:$0xff]  }
  0x40   :  { %v845_v34 = vld [vmem:[#allocation7 + $0xf4] ss:$8 sps:$4 sm:$0xff]   ;;  %v847_v35 = vld [vmem:[#allocation7 + $0xf0] ss:$8 sps:$4 sm:$0xff]   ;;  %v850_v37 = vld [vmem:[#allocation7 + $0xe0] ss:$8 sps:$4 sm:$0xff]  }
  0x41   :  { %v851_v38 = vld [vmem:[#allocation7 + $0xd4] ss:$8 sps:$4 sm:$0xff]   ;;  %v853_v39 = vld [vmem:[#allocation7 + $0xd0] ss:$8 sps:$4 sm:$0xff]   ;;  %v854_v40 = vld [vmem:[#allocation7 + $0xc4] ss:$8 sps:$4 sm:$0xff]  }
  0x42   :  { %206 = vmatpush1.bf16.msra.mxu0 %v807_v8  ;;  %457 = vmatpush1.bf16.msra.mxu1 %v829_v18  ;;  %v856_v41 = vld [vmem:[#allocation7 + $0xc0] ss:$8 sps:$4 sm:$0xff]   ;;  %v857_v42 = vld [vmem:[#allocation7 + $0xb4] ss:$8 sps:$4 sm:$0xff]   ;;  %v859_v43 = vld [vmem:[#allocation7 + $0xb0] ss:$8 sps:$4 sm:$0xff]  }
  0x43   :  { %207 = vmatprep.subr.bf16.mxu0 %v808_v9  ;;  %458 = vmatprep.subr.bf16.mxu1 %v830_v20  ;;  %v860_v44 = vld [vmem:[#allocation7 + $0xa4] ss:$8 sps:$4 sm:$0xff]   ;;  %v862_v45 = vld [vmem:[#allocation7 + $0xa0] ss:$8 sps:$4 sm:$0xff]   ;;  %v863_v46 = vld [vmem:[#allocation7 + $0x94] ss:$8 sps:$4 sm:$0xff]  }
  0x44   :  { %v865_v47 = vld [vmem:[#allocation7 + $0x90] ss:$8 sps:$4 sm:$0xff]   ;;  %v866_v48 = vld [vmem:[#allocation7 + $0x84] ss:$8 sps:$4 sm:$0xff]   ;;  %v868_v49 = vld [vmem:[#allocation7 + $0x80] ss:$8 sps:$4 sm:$0xff]  }
  0x45   :  { %v869_v50 = vld [vmem:[#allocation8 + $0x78] sm:$0xff]   ;;  %v871_v52 = vld [vmem:[#allocation8 + $0x70] sm:$0xff]   ;;  %v874_v55 = vld [vmem:[#allocation8 + $0x28] sm:$0xff]   ;;  %v109_v62 = vsub.s32 1, %v104_v61  ;;  %v105_v63 = vsub.s32 0, %v104_v61  ;;  %s1002_s25 = smov [#allocation10]  }
  0x46   :  { %208 = vmatpush1.bf16.msra.mxu0 %v810_v13  ;;  %459 = vmatpush1.bf16.msra.mxu1 %v832_v22  ;;  %v870_v51 = vld [vmem:[#allocation8 + $0x38] sm:$0xff]   ;;  %v872_v53 = vld [vmem:[#allocation8 + $0x30] sm:$0xff]   ;;  %v875_v56 = vld [vmem:[#allocation8 + $0x60] sm:$0xff]   ;;  %s684_s26 = sshll.u32 %s1002_s25, 4  ;;  %s685_s26 = int_to_ptr.vmem [resolvable:$true] %s684_s26 }
  0x47   :  { %209 = vmatprep.subr.bf16.mxu0 %v811_v15  ;;  %460 = vmatprep.subr.bf16.mxu1 %v833_v24  ;;  %v876_v57 = vld [vmem:[#allocation8 + $0x20] sm:$0xff]   ;;  %v877_v58 = vld [vmem:[#allocation8 + $0x58] sm:$0xff]   ;;  %v880_v18 = vld [vmem:[#allocation8 + $0x10] sm:$0xff]   ;;  %s965_s29 = scalar_lea.vmem %s685_s26, 256  ;;  %p970_p7 = scmp.lt.s32.totalorder %s685_s26, %s685_s26 }
  0x48   :  { %v878_v59 = vld [vmem:[#allocation8 + $0x18] sm:$0xff]   ;;  %v882_v20 = vld [vmem:[#allocation8 + $0x8] sm:$0xff]   ;;  %v884_v22 = vld [vmem:[#allocation8] sm:$0xff]   ;;  %p966_p6 = scmp.ne.s32.totalorder %s685_s26, %s965_s29  ;;  %p971_p8 = scmp.lt.s32.totalorder %s965_s29, %s965_s29 }
  0x49   :  { %v101_v0 = vld [vmem:[%s1078_s2] sm:$0x3] }
  0x4a   :  { %210 = vmatpush1.bf16.msra.mxu0 %v813_v17  ;;  %461 = vmatpush1.bf16.msra.mxu1 %v835_v26  ;;  %v110_v2 = vrot.slane %v101_v0, %v109_v62  ;;  %v106_v3 = vrot.slane %v101_v0, %v105_v63  ;;  %v879_v17 = vld [vmem:[#allocation8 + $0x50] sm:$0xff]   ;;  %p972_p9 = por %p971_p8, %p970_p7 }
  0x4b   :  { %211 = vmatprep.subr.bf16.mxu0 %v814_v19  ;;  %462 = vmatprep.subr.bf16.mxu1 %v836_v28  ;;  %v881_v19 = vld [vmem:[#allocation8 + $0x48] sm:$0xff]  }
  0x4c   :  { %p973_p10 = pnand %p972_p9, %p966_p6 }
  0x4e   :  { %212 = vmatpush1.bf16.msra.mxu0 %v816_v21  ;;  %463 = vmatpush1.bf16.msra.mxu1 %v838_v29  ;;  %v883_v21 = vld [vmem:[#allocation8 + $0x40] sm:$0xff]  }
  0x4f   :  { %213 = vmatprep.subr.bf16.mxu0 %v817_v23  ;;  %464 = vmatprep.subr.bf16.mxu1 %v839_v30  ;;  %v280_v23 = vld [vmem:[%s1080_s4] sm:$0x3] }
  0x50   :  { %v285_v26 = vrot.slane %v280_v23, %v105_v63 }
  0x52   :  { %214 = vmatpush1.bf16.msra.mxu0 %v819_v25  ;;  %465 = vmatpush1.bf16.msra.mxu1 %v841_v31  ;;  %v289_v25 = vrot.slane %v280_v23, %v109_v62 }
  0x53   :  { %466 = vmatprep.subr.bf16.mxu1 %v842_v32  ;;  %764 = vmatprep.subr.bf16.mxu0 %v869_v50 }
  0x55   :  { %232 = vmatmul.mubr.bf16.vlgmr.msra.gmra.mxu0 %v820_v27 }
  0x56   :  { %467 = vmatpush1.bf16.msra.mxu1 %v844_v33  ;;  %765 = vmatpush3.bf16.msra.mxu0 %v870_v51 }
  0x57   :  { %468 = vmatprep.subr.bf16.mxu1 %v845_v34  ;;  %766 = vmatprep.subr.bf16.mxu0 %v871_v52 }
  0x5a   :  { %469 = vmatpush2.bf16.msra.mxu1 %v847_v35  ;;  %767 = vmatpush3.bf16.msra.mxu0 %v872_v53 }
  0x5b   :  { %470 = vmatprep.subr.bf16.mxu1 %v848_v36  ;;  %768 = vmatprep.subr.bf16.mxu0 %v873_v54 }
  0x5e   :  { %471 = vmatpush2.bf16.msra.mxu1 %v850_v37  ;;  %769 = vmatpush3.bf16.msra.mxu0 %v874_v55 }
  0x5f   :  { %472 = vmatprep.subr.bf16.mxu1 %v851_v38  ;;  %770 = vmatprep.subr.bf16.mxu0 %v875_v56 }
  0x62   :  { %473 = vmatpush2.bf16.msra.mxu1 %v853_v39  ;;  %771 = vmatpush3.bf16.msra.mxu0 %v876_v57 }
  0x63   :  { %474 = vmatprep.subr.bf16.mxu1 %v854_v40  ;;  %772 = vmatprep.subr.bf16.mxu0 %v877_v58 }
  0x66   :  { %475 = vmatpush2.bf16.msra.mxu1 %v856_v41  ;;  %773 = vmatpush3.bf16.msra.mxu0 %v878_v59  ;;  %v747_v41 = vld [vmem:[%s1082_s6] ss:$0 sm:$0xff] }
  0x67   :  { %476 = vmatprep.subr.bf16.mxu1 %v857_v42  ;;  %774 = vmatprep.subr.bf16.mxu0 %v879_v17 }
  0x6a   :  { %477 = vmatpush2.bf16.msra.mxu1 %v859_v43  ;;  %775 = vmatpush3.bf16.msra.mxu0 %v880_v18 }
  0x6b   :  { %478 = vmatprep.subr.bf16.mxu1 %v860_v44  ;;  %776 = vmatprep.subr.bf16.mxu0 %v881_v19 }
  0x6e   :  { %479 = vmatpush2.bf16.msra.mxu1 %v862_v45  ;;  %777 = vmatpush3.bf16.msra.mxu0 %v882_v20 }
  0x6f   :  { %480 = vmatprep.subr.bf16.mxu1 %v863_v46  ;;  %778 = vmatprep.subr.bf16.mxu0 %v883_v21 }
  0x72   :  { %481 = vmatpush2.bf16.msra.mxu1 %v865_v47  ;;  %779 = vmatpush3.bf16.msra.mxu0 %v884_v22 }
  0x73   :  { %482 = vmatprep.subr.bf16.mxu1 %v866_v48 }
  0x76   :  { %483 = vmatpush2.bf16.msra.mxu1 %v868_v49 }
 0x115   :  { %v233_v1 = vpop.f32.mrf.mxu0 }
 0x116   :  { %v234_v8 = vadd.f32 %v233_v1, %v106_v3 }
 0x117   :  { %v235_v4 = vpop.f32.mrf.mxu0 }
 0x118   :  { %v236_v6 = vadd.f32 %v235_v4, %v110_v2  ;;  %v242_v14 = vmax.f32 %v234_v8, 0.0 }
 0x119   :  { %v237_v5 = vpop.f32.mrf.mxu0 }
 0x11a   :  { %v238_v7 = vadd.f32 %v237_v5, %v106_v3  ;;  %v243_v12 = vmax.f32 %v236_v6, 0.0 }
 0x11b   :  { %v239_v9 = vpop.f32.mrf.mxu0 }
 0x11c   :  { %v240_v10 = vadd.f32 %v239_v9, %v110_v2  ;;  %v244_v11 = vmax.f32 %v238_v7, 0.0 }
 0x11e   :  { %v245_v13 = vmax.f32 %v240_v10, 0.0  ;;  %v246_v16 = vpack.c.bf16 %v244_v11, %v242_v14 }
 0x120   :  { %v247_v15 = vpack.c.bf16 %v245_v13, %v243_v12 }
 0x122   :  { %484 = vmatprep.mubr.bf16.mxu1 %v247_v15 }
 0x123   :  { %485 = vmatmul.mubr.bf16.vlgmr.msra.gmra.mxu1 %v246_v16 }
 0x1e3   :  { %v486_v24 = vpop.f32.mrf.mxu1 }
 0x1e4   :  { %v487_v31 = vadd.f32 %v486_v24, %v285_v26 }
 0x1e5   :  { %v488_v27 = vpop.f32.mrf.mxu1 }
 0x1e6   :  { %v489_v29 = vadd.f32 %v488_v27, %v289_v25  ;;  %v495_v37 = vmax.f32 %v487_v31, 0.0 }
 0x1e7   :  { %v490_v28 = vpop.f32.mrf.mxu1 }
 0x1e8   :  { %v491_v30 = vadd.f32 %v490_v28, %v285_v26  ;;  %v496_v35 = vmax.f32 %v489_v29, 0.0 }
 0x1e9   :  { %v492_v32 = vpop.f32.mrf.mxu1 }
 0x1ea   :  { %v493_v33 = vadd.f32 %v492_v32, %v289_v25  ;;  %v497_v34 = vmax.f32 %v491_v30, 0.0 }
 0x1ec   :  { %v498_v36 = vmax.f32 %v493_v33, 0.0  ;;  %v499_v39 = vpack.c.bf16 %v497_v34, %v495_v37 }
 0x1ee   :  { %v500_v38 = vpack.c.bf16 %v498_v36, %v496_v35 }
 0x1f0   :  { %668 = vmatprep.mubr.bf16.mxu0 %v500_v38 }
 0x1f1   :  { %669 = vmatmul.mubr.bf16.vlgmr.msra.gmra.mxu0 %v499_v39 }
 0x2b1   :  { %v780_v40 = vpop.f32.mrf.mxu0 }
 0x2b3   :  { %v781_v42 = vpop.f32.mrf.mxu0 }
 0x2b4   :  { %v782_v43 = vadd.f32 %v781_v42, %v780_v40 }
 0x2b5   :  { %v783_v44 = vpop.f32.mrf.mxu0 }
 0x2b6   :  { %v671_v45 = vadd.f32 %v782_v43, %v747_v41 }
 0x2b7   :  { %v784_v46 = vpop.f32.mrf.mxu0 }
 0x2b8   :  { %677 = vst [vmem:[#allocation10] sm:$0xff] %v671_v45  ;;  %v785_v47 = vadd.f32 %v784_v46, %v783_v44 }
 0x2ba   :  { %v674_v48 = vadd.f32 %v785_v47, %v747_v41 }
 0x2bc   :  { %678 = vst [vmem:[#allocation10 + $0x8] sm:$0xff] %v674_v48 }
 0x2bd   :  { %976 = shalt.err (!%p973_p10)
}
 0x2be   :  { %690 = dma.vmem_to_hbm [thread:$0]  %s685_s26, 256, %s1083_s7, [#allocation4], %s994_s27, %s994_s27, %s995_s28  }
 0x2bf   :  { %991 = dma.done.wait [#allocation4], 256  }
 0x2c0   :  { %992 = vsyncadd [#allocation4], 4294967040 }
 0x2c1   :  { %694 = vsyncpa [#allocation3], 1 }
 0x2c2   :  { %695 = vsyncpa [#allocation6], 1 }
 0x2c3   :  { %696 = vsyncpa [#allocation9], 1 }
 0x2c4   :  { %697 = vsyncpa [#allocation4], 1 }

</bundles_post_ra>
